<compile_context>
chip_gen: v6e
topology: v6e:2x2x1
jax: 0.10.0
libtpu: 0.0.40
codegen_flags: <defaults>
</compile_context>

<pallas_src>
import functools

import jax
import jax.numpy as jnp
from jax.experimental import pallas as pl
from jax.experimental.pallas import tpu as pltpu


def _round_up(x, m):
    return (x + m - 1) // m * m


# ----------------------------------------------------------------------------
# Kernel 1: conv1 (+bias) -> LeakyReLU -> conv2, plus per-tile BN statistics.
# ----------------------------------------------------------------------------
def _stage1_kernel(x_ref, w1_ref, b1_ref, w2_ref, h2_ref, stat_ref,
                   *, tm, m_valid, needs_mask, slope):
    # conv1: (TM, C0) @ (C0, C1) -> f32, plus bias, LeakyReLU(0.2)
    h1 = jnp.dot(x_ref[...], w1_ref[...], preferred_element_type=jnp.float32)
    h1 = h1 + b1_ref[...]
    h1 = jnp.where(h1 >= 0.0, h1, slope * h1)

    # conv2 (no bias): (TM, C1) @ (C1, C2) -> f32
    h2 = jnp.dot(h1.astype(w2_ref.dtype), w2_ref[...],
                 preferred_element_type=jnp.float32)
    h2_ref[...] = h2

    c2 = h2.shape[1]

    # BatchNorm partial statistics for this row tile (mask out padded rows).
    if needs_mask:
        i = pl.program_id(0)
        row = i * tm + jax.lax.broadcasted_iota(jnp.int32, h2.shape, 0)
        h2s = jnp.where(row < m_valid, h2, 0.0)
    else:
        h2s = h2
    tsum = jnp.sum(h2s, axis=0, keepdims=True)        # (1, C2)
    tssq = jnp.sum(h2s * h2s, axis=0, keepdims=True)  # (1, C2)

    # Pack [sum; sumsq; zeros...] into one (8, C2) sublane-aligned block.
    ridx = jax.lax.broadcasted_iota(jnp.int32, (8, c2), 0)
    packed = jnp.where(ridx == 0, jnp.broadcast_to(tsum, (8, c2)),
                       jnp.where(ridx == 1, jnp.broadcast_to(tssq, (8, c2)), 0.0))
    stat_ref[0] = packed


# ----------------------------------------------------------------------------
# Kernel 2: BN affine -> LeakyReLU -> conv3 (no bias).
# ----------------------------------------------------------------------------
def _stage2_kernel(h2_ref, scale_ref, shift_ref, w3_ref, o_ref, *, slope):
    y = h2_ref[...] * scale_ref[...] + shift_ref[...]
    y = jnp.where(y >= 0.0, y, slope * y)
    o_ref[...] = jnp.dot(y, w3_ref[...], preferred_element_type=jnp.float32)


# ----------------------------------------------------------------------------
# Forward pass
# ----------------------------------------------------------------------------
def pixel_discriminator_forward(x_nchw, params, tm=128):
    N, C, H, W = x_nchw.shape
    M = N * H * W

    w1 = params["w1"]   # (ndf,   input_nc, 1, 1)
    b1 = params["b1"]   # (ndf,)
    w2 = params["w2"]   # (2*ndf, ndf,      1, 1)
    w3 = params["w3"]   # (1,     2*ndf,    1, 1)
    c1, c0 = w1.shape[0], w1.shape[1]
    c2 = w2.shape[0]
    assert C == c0

    # NCHW -> (rows, channels) slab; channels on the lane axis.
    x2d = jnp.transpose(x_nchw, (0, 2, 3, 1)).reshape(M, c0)

    # Weight matrices (bf16 for MXU throughput, f32 accumulation in-kernel).
    w1m = jnp.transpose(w1.reshape(c1, c0), (1, 0)).astype(jnp.bfloat16)   # (C0, C1)
    b1m = b1.reshape(1, c1).astype(jnp.float32)
    w2m = jnp.transpose(w2.reshape(c2, c1), (1, 0)).astype(jnp.bfloat16)   # (C1, C2)
    w3m = jnp.transpose(w3.reshape(1, c2), (1, 0)).astype(jnp.float32)     # (C2, 1)

    # Pad only the row axis, only if needed; channels stay unpadded end-to-end.
    Mp = _round_up(M, tm)
    x_bf = x2d.astype(jnp.bfloat16)
    if Mp != M:
        x_bf = jnp.zeros((Mp, c0), jnp.bfloat16).at[:M].set(x_bf)
    grid_m = Mp // tm

    kernel1 = functools.partial(_stage1_kernel, tm=tm, m_valid=M,
                                needs_mask=(Mp != M), slope=0.2)
    h2, stats = pl.pallas_call(
        kernel1,
        out_shape=(
            jax.ShapeDtypeStruct((Mp, c2), jnp.float32),
            jax.ShapeDtypeStruct((grid_m, 8, c2), jnp.float32),
        ),
        grid=(grid_m,),
        in_specs=[
            pl.BlockSpec((tm, c0), lambda i: (i, 0)),
            pl.BlockSpec((c0, c1), lambda i: (0, 0)),
            pl.BlockSpec((1, c1), lambda i: (0, 0)),
            pl.BlockSpec((c1, c2), lambda i: (0, 0)),
        ],
        out_specs=[
            pl.BlockSpec((tm, c2), lambda i: (i, 0)),
            pl.BlockSpec((1, 8, c2), lambda i: (i, 0, 0)),
        ],
        compiler_params=pltpu.CompilerParams(dimension_semantics=("parallel",)),
    )(x_bf, w1m, b1m, w2m)

    # Finalize BatchNorm2d batch statistics (training-mode forward: biased variance,
    # gamma=1, beta=0, eps=1e-5).  This reduction is over a tiny (grid_m, C2) array.
    sums = jnp.sum(stats[:, 0, :], axis=0)
    ssqs = jnp.sum(stats[:, 1, :], axis=0)
    mean = sums / M
    var = jnp.maximum(ssqs / M - mean * mean, 0.0)
    inv = 1.0 / jnp.sqrt(var + 1e-5)
    scale = inv.reshape(1, c2)
    shift = (-mean * inv).reshape(1, c2)

    kernel2 = functools.partial(_stage2_kernel, slope=0.2)
    out = pl.pallas_call(
        kernel2,
        out_shape=jax.ShapeDtypeStruct((Mp, 1), jnp.float32),
        grid=(grid_m,),
        in_specs=[
            pl.BlockSpec((tm, c2), lambda i: (i, 0)),
            pl.BlockSpec((1, c2), lambda i: (0, 0)),
            pl.BlockSpec((1, c2), lambda i: (0, 0)),
            pl.BlockSpec((c2, 1), lambda i: (0, 0)),
        ],
        out_specs=pl.BlockSpec((tm, 1), lambda i: (i, 0)),
        compiler_params=pltpu.CompilerParams(dimension_semantics=("parallel",)),
    )(h2, scale, shift, w3m)

    out = out[:M].reshape(N, H, W, 1)
    return jnp.transpose(out, (0, 3, 1, 2))   # (N, 1, H, W)


# ----------------------------------------------------------------------------
# Deterministic parameter init (shapes follow PixelDiscriminator.__init__ with
# norm_layer=BatchNorm2d => conv1 bias=True, conv2/conv3 bias=False).
# ----------------------------------------------------------------------------
def init_params(key, input_nc=3, ndf=64):
    k1, k2, k3, k4 = jax.random.split(key, 4)

    def w(k, shape, scale=0.05):
        return (jax.random.normal(k, shape) * scale).astype(jnp.float32)

    return {
        "w1": w(k1, (ndf, input_nc, 1, 1)),
        "b1": w(k2, (ndf,)),
        "w2": w(k3, (ndf * 2, ndf, 1, 1)),
        "w3": w(k4, (1, ndf * 2, 1, 1)),
    }


# ----------------------------------------------------------------------------
if __name__ == "__main__":
    key = jax.random.PRNGKey(0)
    k_x, k_p = jax.random.split(key)

    batch, input_nc, ndf, spatial = 2, 4, 64, 16
    x = jax.random.normal(k_x, (batch, input_nc, spatial, spatial), jnp.float32)
    params = init_params(k_p, input_nc=input_nc, ndf=ndf)

    fwd = jax.jit(pixel_discriminator_forward)
    out = fwd(x, params)
    out = jax.block_until_ready(out)

    assert out.shape == (batch, 1, spatial, spatial), out.shape
    assert bool(jnp.all(jnp.isfinite(out)))
    print("KERNEL_OK")
</pallas_src>

<mosaic_0001>
module attributes {stable_mosaic.version = 11 : i64} {
  func.func @_stage1_kernel(%arg0: i32, %arg1: memref<128x4xbf16, #tpu.memory_space<vmem>>, %arg2: memref<4x64xbf16, #tpu.memory_space<vmem>>, %arg3: memref<1x64xf32, #tpu.memory_space<vmem>>, %arg4: memref<64x128xbf16, #tpu.memory_space<vmem>>, %arg5: memref<128x128xf32, #tpu.memory_space<vmem>>, %arg6: memref<1x8x128xf32, #tpu.memory_space<vmem>>) attributes {dimension_semantics = [#tpu.dimension_semantics<parallel>], iteration_bounds = array<i64: 4>, scalar_prefetch = 0 : i64, scratch_operands = 0 : i64, tpu.core_type = #tpu.core_type<tc>, window_params = [{transform_indices = @transform_0, window_bounds = array<i64: 128, 4>}, {pipeline_mode = #tpu.pipeline_mode<synchronous>, transform_indices = @transform_1, window_bounds = array<i64: 4, 64>}, {pipeline_mode = #tpu.pipeline_mode<synchronous>, transform_indices = @transform_2, window_bounds = array<i64: 1, 64>}, {pipeline_mode = #tpu.pipeline_mode<synchronous>, transform_indices = @transform_3, window_bounds = array<i64: 64, 128>}, {transform_indices = @transform_4, window_bounds = array<i64: 128, 128>}, {transform_indices = @transform_5, window_bounds = array<i64: 1, 8, 128>}]} {
    %c0 = arith.constant 0 : index
    %c0_0 = arith.constant 0 : index
    %0 = vector.load %arg1[%c0, %c0_0] : memref<128x4xbf16, #tpu.memory_space<vmem>>, vector<128x4xbf16>
    %c0_1 = arith.constant 0 : index
    %c0_2 = arith.constant 0 : index
    %1 = vector.load %arg2[%c0_1, %c0_2] : memref<4x64xbf16, #tpu.memory_space<vmem>>, vector<4x64xbf16>
    %cst = arith.constant dense<0.000000e+00> : vector<128x64xf32>
    %2 = tpu.matmul %0, %1, %cst {dimension_numbers = #tpu.dot_dimension_numbers<[1], [0], [0], [1], [0, 0, 1, 1], [], []>} : vector<128x4xbf16>, vector<4x64xbf16>, vector<128x64xf32> -> vector<128x64xf32>
    %c0_3 = arith.constant 0 : index
    %c0_4 = arith.constant 0 : index
    %3 = vector.load %arg3[%c0_3, %c0_4] : memref<1x64xf32, #tpu.memory_space<vmem>>, vector<1x64xf32>
    %4 = vector.broadcast %3 : vector<1x64xf32> to vector<128x64xf32>
    %5 = arith.addf %2, %4 : vector<128x64xf32>
    %cst_5 = arith.constant 0.000000e+00 : f32
    %6 = vector.broadcast %cst_5 : f32 to vector<128x64xf32>
    %7 = arith.cmpf oge, %5, %6 : vector<128x64xf32>
    %cst_6 = arith.constant 2.000000e-01 : f32
    %8 = vector.broadcast %cst_6 : f32 to vector<128x64xf32>
    %9 = arith.mulf %8, %5 : vector<128x64xf32>
    %10 = arith.select %7, %5, %9 : vector<128x64xi1>, vector<128x64xf32>
    %11 = arith.truncf %10 : vector<128x64xf32> to vector<128x64xbf16>
    %c0_7 = arith.constant 0 : index
    %c0_8 = arith.constant 0 : index
    %12 = vector.load %arg4[%c0_7, %c0_8] : memref<64x128xbf16, #tpu.memory_space<vmem>>, vector<64x128xbf16>
    %cst_9 = arith.constant dense<0.000000e+00> : vector<128x128xf32>
    %13 = tpu.matmul %11, %12, %cst_9 {dimension_numbers = #tpu.dot_dimension_numbers<[1], [0], [0], [1], [0, 0, 1, 1], [], []>} : vector<128x64xbf16>, vector<64x128xbf16>, vector<128x128xf32> -> vector<128x128xf32>
    %c0_10 = arith.constant 0 : index
    %c0_11 = arith.constant 0 : index
    %14 = vector.load %arg5[%c0_10, %c0_11] : memref<128x128xf32, #tpu.memory_space<vmem>>, vector<128x128xf32>
    tpu.vector_store %arg5[%c0_10, %c0_11], %13 {strides = array<i32>} : memref<128x128xf32, #tpu.memory_space<vmem>>, vector<128x128xf32>,
    %cst_12 = arith.constant dense<0.000000e+00> : vector<128xf32>
    %15 = vector.multi_reduction <add>, %13, %cst_12 [0] : vector<128x128xf32> to vector<128xf32>
    %16 = vector.shape_cast %15 : vector<128xf32> to vector<1x128xf32>
    %17 = arith.mulf %13, %13 : vector<128x128xf32>
    %cst_13 = arith.constant dense<0.000000e+00> : vector<128xf32>
    %18 = vector.multi_reduction <add>, %17, %cst_13 [0] : vector<128x128xf32> to vector<128xf32>
    %19 = vector.shape_cast %18 : vector<128xf32> to vector<1x128xf32>
    %20 = tpu.iota {dimensions = array<i32: 0>} : vector<8x128xi32>
    %c0_i32 = arith.constant 0 : i32
    %21 = vector.broadcast %c0_i32 : i32 to vector<8x128xi32>
    %22 = arith.cmpi eq, %20, %21 : vector<8x128xi32>
    %23 = vector.shape_cast %16 : vector<1x128xf32> to vector<1x128xf32>
    %24 = vector.broadcast %23 : vector<1x128xf32> to vector<8x128xf32>
    %c1_i32 = arith.constant 1 : i32
    %25 = vector.broadcast %c1_i32 : i32 to vector<8x128xi32>
    %26 = arith.cmpi eq, %20, %25 : vector<8x128xi32>
    %27 = vector.shape_cast %19 : vector<1x128xf32> to vector<1x128xf32>
    %28 = vector.broadcast %27 : vector<1x128xf32> to vector<8x128xf32>
    %cst_14 = arith.constant 0.000000e+00 : f32
    %29 = vector.broadcast %cst_14 : f32 to vector<8x128xf32>
    %30 = arith.select %26, %28, %29 : vector<8x128xi1>, vector<8x128xf32>
    %31 = arith.select %22, %24, %30 : vector<8x128xi1>, vector<8x128xf32>
    %c0_15 = arith.constant 0 : index
    %c0_16 = arith.constant 0 : index
    %c0_17 = arith.constant 0 : index
    %32 = vector.load %arg6[%c0_15, %c0_16, %c0_17] : memref<1x8x128xf32, #tpu.memory_space<vmem>>, vector<1x8x128xf32>
    %33 = vector.shape_cast %32 : vector<1x8x128xf32> to vector<8x128xf32>
    %34 = vector.shape_cast %31 : vector<8x128xf32> to vector<1x8x128xf32>
    tpu.vector_store %arg6[%c0_15, %c0_16, %c0_17], %34 {strides = array<i32>} : memref<1x8x128xf32, #tpu.memory_space<vmem>>, vector<1x8x128xf32>,
    return
  }
  func.func @transform_0(%arg0: i32) -> (i32, i32) {
    %c0_i32 = arith.constant 0 : i32
    %c0_i32_0 = arith.constant 0 : i32
    return %arg0, %c0_i32 : i32, i32
  }
  func.func @transform_1(%arg0: i32) -> (i32, i32) {
    %c0_i32 = arith.constant 0 : i32
    %c0_i32_0 = arith.constant 0 : i32
    %c0_i32_1 = arith.constant 0 : i32
    return %c0_i32, %c0_i32_0 : i32, i32
  }
  func.func @transform_2(%arg0: i32) -> (i32, i32) {
    %c0_i32 = arith.constant 0 : i32
    %c0_i32_0 = arith.constant 0 : i32
    %c0_i32_1 = arith.constant 0 : i32
    return %c0_i32, %c0_i32_0 : i32, i32
  }
  func.func @transform_3(%arg0: i32) -> (i32, i32) {
    %c0_i32 = arith.constant 0 : i32
    %c0_i32_0 = arith.constant 0 : i32
    %c0_i32_1 = arith.constant 0 : i32
    return %c0_i32, %c0_i32_0 : i32, i32
  }
  func.func @transform_4(%arg0: i32) -> (i32, i32) {
    %c0_i32 = arith.constant 0 : i32
    %c0_i32_0 = arith.constant 0 : i32
    return %arg0, %c0_i32 : i32, i32
  }
  func.func @transform_5(%arg0: i32) -> (i32, i32, i32) {
    %c0_i32 = arith.constant 0 : i32
    %c0_i32_0 = arith.constant 0 : i32
    %c0_i32_1 = arith.constant 0 : i32
    return %arg0, %c0_i32, %c0_i32_0 : i32, i32, i32
  }
}

module attributes {stable_mosaic.version = 11 : i64} {
  func.func @_stage2_kernel(%arg0: i32, %arg1: memref<128x128xf32, #tpu.memory_space<vmem>>, %arg2: memref<1x128xf32, #tpu.memory_space<vmem>>, %arg3: memref<1x128xf32, #tpu.memory_space<vmem>>, %arg4: memref<128x1xf32, #tpu.memory_space<vmem>>, %arg5: memref<128x1xf32, #tpu.memory_space<vmem>>) attributes {dimension_semantics = [#tpu.dimension_semantics<parallel>], iteration_bounds = array<i64: 4>, scalar_prefetch = 0 : i64, scratch_operands = 0 : i64, tpu.core_type = #tpu.core_type<tc>, window_params = [{transform_indices = @transform_0, window_bounds = array<i64: 128, 128>}, {pipeline_mode = #tpu.pipeline_mode<synchronous>, transform_indices = @transform_1, window_bounds = array<i64: 1, 128>}, {pipeline_mode = #tpu.pipeline_mode<synchronous>, transform_indices = @transform_2, window_bounds = array<i64: 1, 128>}, {pipeline_mode = #tpu.pipeline_mode<synchronous>, transform_indices = @transform_3, window_bounds = array<i64: 128, 1>}, {transform_indices = @transform_4, window_bounds = array<i64: 128, 1>}]} {
    %c0 = arith.constant 0 : index
    %c0_0 = arith.constant 0 : index
    %0 = vector.load %arg1[%c0, %c0_0] : memref<128x128xf32, #tpu.memory_space<vmem>>, vector<128x128xf32>
    %c0_1 = arith.constant 0 : index
    %c0_2 = arith.constant 0 : index
    %1 = vector.load %arg2[%c0_1, %c0_2] : memref<1x128xf32, #tpu.memory_space<vmem>>, vector<1x128xf32>
    %2 = vector.broadcast %1 : vector<1x128xf32> to vector<128x128xf32>
    %3 = arith.mulf %0, %2 : vector<128x128xf32>
    %c0_3 = arith.constant 0 : index
    %c0_4 = arith.constant 0 : index
    %4 = vector.load %arg3[%c0_3, %c0_4] : memref<1x128xf32, #tpu.memory_space<vmem>>, vector<1x128xf32>
    %5 = vector.broadcast %4 : vector<1x128xf32> to vector<128x128xf32>
    %6 = arith.addf %3, %5 : vector<128x128xf32>
    %cst = arith.constant 0.000000e+00 : f32
    %7 = vector.broadcast %cst : f32 to vector<128x128xf32>
    %8 = arith.cmpf oge, %6, %7 : vector<128x128xf32>
    %cst_5 = arith.constant 2.000000e-01 : f32
    %9 = vector.broadcast %cst_5 : f32 to vector<128x128xf32>
    %10 = arith.mulf %9, %6 : vector<128x128xf32>
    %11 = arith.select %8, %6, %10 : vector<128x128xi1>, vector<128x128xf32>
    %c0_6 = arith.constant 0 : index
    %c0_7 = arith.constant 0 : index
    %12 = vector.load %arg4[%c0_6, %c0_7] : memref<128x1xf32, #tpu.memory_space<vmem>>, vector<128x1xf32>
    %cst_8 = arith.constant dense<0.000000e+00> : vector<128x1xf32>
    %13 = tpu.matmul %11, %12, %cst_8 {dimension_numbers = #tpu.dot_dimension_numbers<[1], [0], [0], [1], [0, 0, 1, 1], [], []>} : vector<128x128xf32>, vector<128x1xf32>, vector<128x1xf32> -> vector<128x1xf32>
    %c0_9 = arith.constant 0 : index
    %c0_10 = arith.constant 0 : index
    %14 = vector.load %arg5[%c0_9, %c0_10] : memref<128x1xf32, #tpu.memory_space<vmem>>, vector<128x1xf32>
    tpu.vector_store %arg5[%c0_9, %c0_10], %13 {strides = array<i32>} : memref<128x1xf32, #tpu.memory_space<vmem>>, vector<128x1xf32>,
    return
  }
  func.func @transform_0(%arg0: i32) -> (i32, i32) {
    %c0_i32 = arith.constant 0 : i32
    %c0_i32_0 = arith.constant 0 : i32
    return %arg0, %c0_i32 : i32, i32
  }
  func.func @transform_1(%arg0: i32) -> (i32, i32) {
    %c0_i32 = arith.constant 0 : i32
    %c0_i32_0 = arith.constant 0 : i32
    %c0_i32_1 = arith.constant 0 : i32
    return %c0_i32, %c0_i32_0 : i32, i32
  }
  func.func @transform_2(%arg0: i32) -> (i32, i32) {
    %c0_i32 = arith.constant 0 : i32
    %c0_i32_0 = arith.constant 0 : i32
    %c0_i32_1 = arith.constant 0 : i32
    return %c0_i32, %c0_i32_0 : i32, i32
  }
  func.func @transform_3(%arg0: i32) -> (i32, i32) {
    %c0_i32 = arith.constant 0 : i32
    %c0_i32_0 = arith.constant 0 : i32
    %c0_i32_1 = arith.constant 0 : i32
    return %c0_i32, %c0_i32_0 : i32, i32
  }
  func.func @transform_4(%arg0: i32) -> (i32, i32) {
    %c0_i32 = arith.constant 0 : i32
    %c0_i32_0 = arith.constant 0 : i32
    return %arg0, %c0_i32 : i32, i32
  }
}

</mosaic_0001>

<bundles_post_ra>
// kernel: pixel_discriminator_forward.3
= control target key start
LH: loop header
LB: loop body
LE: loop exit
PB: predicated region body
PF: predicated region fallthrough
CT: control target
= control target key end

     0   :  { %s719_s15 = smov 0   ;;  %s895_s0 = inlined_call_operand.vmem [shape: f32[512,128], index: 0, kind: input, shape index: {}]   ;;  %s896_s1 = inlined_call_operand.vmem [shape: f32[1,128], index: 1, kind: input, shape index: {}]   ;;  %s897_s2 = inlined_call_operand.vmem [shape: f32[1,128], index: 2, kind: input, shape index: {}]   ;;  %s898_s3 = inlined_call_operand.vmem [shape: f32[128,1], index: 3, kind: input, shape index: {}]   ;;  %s899_s4 = inlined_call_operand.vmem [shape: f32[512,1], index: 4, kind: output, shape index: {}]  }
   0x1 LB: > { %s545_s16 = sadd.s32 4294967295, %s692_s15   ;;  %p549_p0 = scmp.ge.s32.totalorder %s692_s15, 1  ;;  %s692_s15 = sphi %s719_s15, %s14_s15  }
   0x2   : > { %p163_p1 = scmp.lt.s32.totalorder %s692_s15, 5 }
   0x4   : > { %p164_p2 = pnand %p549_p0, %p163_p1 }
   0x5   : > { %s550_s21 = sshll.u32 (!%p164_p2), %s545_s16, 4 }
   0x6   : > { %167 = sbr.rel (%p164_p2) target bundleno = 253 (0xfd), region = 36  ;;  %p190_p3 = scmp.lt.s32.totalorder (!%p164_p2), %s550_s21, 63 }
   0xb   : > { %v326_v0 = vld [vmem:[%s898_s3 + $0x78] sm:$0xff]  ;;  %v325_v1 = vld [vmem:[%s898_s3 + $0x70] sm:$0xff]  ;;  %v324_v2 = vld [vmem:[%s898_s3 + $0x68] sm:$0xff]  ;;  %s901_s21 = smov (!%p190_p3, %s550_s21), 63 }
   0xc   : > { %590 = vmatprep.subr.mxu0 %v326_v0  ;;  %646 = vmatprep.subr.mxu1 %v326_v0  ;;  %v323_v3 = vld [vmem:[%s898_s3 + $0x60] sm:$0xff]  ;;  %s551_s26 = sshll.u32 %s901_s21, 3  ;;  %v322_v4 = vld [vmem:[%s898_s3 + $0x58] sm:$0xff]  ;;  %v321_v5 = vld [vmem:[%s898_s3 + $0x50] sm:$0xff] }
   0xd   : > { %591 = vmatpush3.msra.mxu0 %v326_v0  ;;  %662 = vmatpush3.msra.mxu1 %v326_v0  ;;  %s750_s5 = scalar_lea.vmem %s895_s0, %s551_s26  ;;  %v759_v7 = vld [vmem:[%s896_s1] ss:$0 sm:$0xff]  ;;  %v320_v8 = vld [vmem:[%s898_s3 + $0x48] sm:$0xff]  ;;  %v318_v17 = vld [vmem:[%s898_s3 + $0x38] sm:$0xff]  ;;  %s858_s11 = scalar_lea.vmem %s899_s4, %s551_s26 }
   0xe   : > { %592 = vmatprep.subr.mxu0 %v325_v1  ;;  %647 = vmatprep.subr.mxu1 %v325_v1  ;;  %v201_v6 = vld [vmem:[%s750_s5] sm:$0xff]  ;;  %v202_v12 = vld [vmem:[%s750_s5 + $0x8] sm:$0xff]  ;;  %v203_v16 = vld [vmem:[%s750_s5 + $0x10] sm:$0xff] }
   0xf   : > { %593 = vmatpush3.msra.mxu0 %v325_v1  ;;  %663 = vmatpush3.msra.mxu1 %v325_v1  ;;  %v209_v9 = vld [vmem:[%s750_s5 + $0x40] sm:$0xff]  ;;  %v224_v11 = vmul.f32 %v759_v7, %v201_v6  ;;  %v210_v13 = vld [vmem:[%s750_s5 + $0x48] sm:$0xff]  ;;  %v225_v18 = vmul.f32 %v759_v7, %v202_v12  ;;  %v317_v20 = vld [vmem:[%s898_s3 + $0x30] sm:$0xff]  ;;  %v226_v22 = vmul.f32 %v759_v7, %v203_v16 }
  0x10   : > { %594 = vmatprep.subr.mxu0 %v324_v2  ;;  %648 = vmatprep.subr.mxu1 %v324_v2  ;;  %v319_v10 = vld [vmem:[%s898_s3 + $0x40] sm:$0xff]  ;;  %v232_v15 = vmul.f32 %v759_v7, %v209_v9  ;;  %v233_v19 = vmul.f32 %v759_v7, %v210_v13  ;;  %v211_v23 = vld [vmem:[%s750_s5 + $0x50] sm:$0xff]  ;;  %v316_v25 = vld [vmem:[%s898_s3 + $0x28] sm:$0xff] }
  0x11   : > { %595 = vmatpush3.msra.mxu0 %v324_v2  ;;  %664 = vmatpush3.msra.mxu1 %v324_v2  ;;  %v774_v14 = vld [vmem:[%s897_s2] ss:$0 sm:$0xff]  ;;  %v204_v26 = vld [vmem:[%s750_s5 + $0x18] sm:$0xff]  ;;  %v234_v30 = vmul.f32 %v759_v7, %v211_v23  ;;  %v206_v45 = vld [vmem:[%s750_s5 + $0x28] sm:$0xff] }
  0x12   : > { %596 = vmatprep.subr.mxu0 %v323_v3  ;;  %649 = vmatprep.subr.mxu1 %v323_v3  ;;  %v247_v21 = vadd.f32 %v774_v14, %v224_v11  ;;  %v255_v24 = vadd.f32 %v774_v14, %v232_v15  ;;  %v212_v27 = vld [vmem:[%s750_s5 + $0x58] sm:$0xff]  ;;  %v248_v28 = vadd.f32 %v774_v14, %v225_v18  ;;  %v205_v31 = vld [vmem:[%s750_s5 + $0x20] sm:$0xff]  ;;  %v313_v46 = vld [vmem:[%s898_s3 + $0x10] sm:$0xff] }
  0x13   : > { %597 = vmatpush3.msra.mxu0 %v323_v3  ;;  %665 = vmatpush3.msra.mxu1 %v323_v3  ;;  %v256_v29 = vadd.f32 %v774_v14, %v233_v19  ;;  %v213_v32 = vld [vmem:[%s750_s5 + $0x60] sm:$0xff]  ;;  %v249_v35 = vadd.f32 %v774_v14, %v226_v22  ;;  %v227_v37 = vmul.f32 %v759_v7, %v204_v26  ;;  %v314_v39 = vld [vmem:[%s898_s3 + $0x18] sm:$0xff]  ;;  %v214_v49 = vld [vmem:[%s750_s5 + $0x68] sm:$0xff] }
  0x14   : > { %598 = vmatprep.subr.mxu0 %v322_v4  ;;  %650 = vmatprep.subr.mxu1 %v322_v4  ;;  %v315_v33 = vld [vmem:[%s898_s3 + $0x20] sm:$0xff]  ;;  %v279_v34 = vmul.f32 0.2, %v247_v21  ;;  %vm263_vm0 = vcmp.ge.f32.partialorder %v247_v21, 0.0  ;;  %v287_v36 = vmul.f32 0.2, %v255_v24  ;;  %v235_v38 = vmul.f32 %v759_v7, %v212_v27 }
  0x15   : > { %599 = vmatpush3.msra.mxu0 %v322_v4  ;;  %666 = vmatpush3.msra.mxu1 %v322_v4  ;;  %vm271_vm1 = vcmp.ge.f32.partialorder %v255_v24, 0.0  ;;  %v228_v40 = vmul.f32 %v759_v7, %v205_v31  ;;  %v236_v41 = vmul.f32 %v759_v7, %v213_v32  ;;  %v280_v42 = vmul.f32 0.2, %v248_v28  ;;  %v207_v53 = vld [vmem:[%s750_s5 + $0x30] sm:$0xff]  ;;  %v312_v55 = vld [vmem:[%s898_s3 + $0x8] sm:$0xff]  ;;  %v311_v62 = vld [vmem:[%s898_s3] sm:$0xff] }
  0x16   : > { %600 = vmatprep.subr.mxu0 %v321_v5  ;;  %651 = vmatprep.subr.mxu1 %v321_v5  ;;  %v288_v43 = vmul.f32 0.2, %v256_v29  ;;  %v257_v44 = vadd.f32 %v774_v14, %v234_v30  ;;  %v295_v47 = vsel %vm263_vm0, %v247_v21, %v279_v34  ;;  %vm264_vm2 = vcmp.ge.f32.partialorder %v248_v28, 0.0  ;;  %v215_v54 = vld [vmem:[%s750_s5 + $0x70] sm:$0xff]  ;;  %v208_v3 = vld [vmem:[%s750_s5 + $0x38] sm:$0xff] }
  0x17   : > { %601 = vmatpush3.msra.mxu0 %v321_v5  ;;  %667 = vmatpush3.msra.mxu1 %v321_v5  ;;  %vm272_vm3 = vcmp.ge.f32.partialorder %v256_v29, 0.0  ;;  %v281_v48 = vmul.f32 0.2, %v249_v35  ;;  %v303_v50 = vsel %vm271_vm1, %v255_v24, %v287_v36  ;;  %vm265_vm4 = vcmp.ge.f32.partialorder %v249_v35, 0.0  ;;  %v216_v4 = vld [vmem:[%s750_s5 + $0x78] sm:$0xff] }
  0x18   : > { %602 = vmatprep.subr.mxu0 %v320_v8  ;;  %652 = vmatprep.subr.mxu1 %v320_v8  ;;  %v250_v51 = vadd.f32 %v774_v14, %v227_v37  ;;  %v258_v52 = vadd.f32 %v774_v14, %v235_v38  ;;  %v251_v56 = vadd.f32 %v774_v14, %v228_v40  ;;  %vm273_vm5 = vcmp.ge.f32.partialorder %v257_v44, 0.0 }
  0x19   : > { %603 = vmatpush3.msra.mxu0 %v320_v8  ;;  %668 = vmatpush3.msra.mxu1 %v320_v8  ;;  %v259_v57 = vadd.f32 %v774_v14, %v236_v41  ;;  %v229_v58 = vmul.f32 %v759_v7, %v206_v45  ;;  %v296_v59 = vsel %vm264_vm2, %v248_v28, %v280_v42  ;;  %v289_v0 = vmul.f32 0.2, %v257_v44 }
  0x1a   : > { %604 = vmatprep.subr.mxu0 %v319_v10  ;;  %653 = vmatprep.subr.mxu1 %v319_v10  ;;  %v304_v60 = vsel %vm272_vm3, %v256_v29, %v288_v43  ;;  %v237_v61 = vmul.f32 %v759_v7, %v214_v49  ;;  %v297_v63 = vsel %vm265_vm4, %v249_v35, %v281_v48  ;;  %vm266_vm6 = vcmp.ge.f32.partialorder %v250_v51, 0.0 }
  0x1b   : > { %605 = vmatpush3.msra.mxu0 %v319_v10  ;;  %669 = vmatpush3.msra.mxu1 %v319_v10  ;;  %v230_v1 = vmul.f32 %v759_v7, %v207_v53  ;;  %v238_v2 = vmul.f32 %v759_v7, %v215_v54  ;;  %v282_v5 = vmul.f32 0.2, %v250_v51  ;;  %vm274_vm7 = vcmp.ge.f32.partialorder %v258_v52, 0.0 }
  0x1c   : > { %606 = vmatprep.subr.mxu0 %v318_v17  ;;  %654 = vmatprep.subr.mxu1 %v318_v17  ;;  %v290_v6 = vmul.f32 0.2, %v258_v52  ;;  %vm267_vm8 = vcmp.ge.f32.partialorder %v251_v56, 0.0  ;;  %v283_v8 = vmul.f32 0.2, %v251_v56  ;;  %v252_v10 = vadd.f32 %v774_v14, %v229_v58 }
  0x1d   : > { %607 = vmatpush3.msra.mxu0 %v318_v17  ;;  %670 = vmatpush3.msra.mxu1 %v318_v17  ;;  %v291_v9 = vmul.f32 0.2, %v259_v57  ;;  %vm275_vm9 = vcmp.ge.f32.partialorder %v259_v57, 0.0  ;;  %v260_v11 = vadd.f32 %v774_v14, %v237_v61  ;;  %v231_v12 = vmul.f32 %v759_v7, %v208_v3 }
  0x1e   : > { %608 = vmatprep.subr.mxu0 %v317_v20  ;;  %655 = vmatprep.subr.mxu1 %v317_v20  ;;  %v239_v13 = vmul.f32 %v759_v7, %v216_v4  ;;  %v305_v15 = vsel %vm273_vm5, %v257_v44, %v289_v0  ;;  %v253_v16 = vadd.f32 %v774_v14, %v230_v1  ;;  %v284_v21 = vmul.f32 0.2, %v252_v10 }
  0x1f   : > { %609 = vmatpush3.msra.mxu0 %v317_v20  ;;  %671 = vmatpush3.msra.mxu1 %v317_v20  ;;  %v261_v17 = vadd.f32 %v774_v14, %v238_v2  ;;  %v298_v18 = vsel %vm266_vm6, %v250_v51, %v282_v5  ;;  %v306_v19 = vsel %vm274_vm7, %v258_v52, %v290_v6  ;;  %v292_v22 = vmul.f32 0.2, %v260_v11 }
  0x20   : > { %610 = vmatprep.subr.mxu0 %v316_v25  ;;  %656 = vmatprep.subr.mxu1 %v316_v25  ;;  %v299_v20 = vsel %vm267_vm8, %v251_v56, %v283_v8  ;;  %v307_v7 = vsel %vm275_vm9, %v259_v57, %v291_v9  ;;  %v254_v23 = vadd.f32 %v774_v14, %v231_v12  ;;  %vm268_vm10 = vcmp.ge.f32.partialorder %v252_v10, 0.0 }
  0x21   : > { %611 = vmatpush3.msra.mxu0 %v316_v25  ;;  %672 = vmatpush3.msra.mxu1 %v316_v25  ;;  %v262_v24 = vadd.f32 %v774_v14, %v239_v13  ;;  %vm276_vm11 = vcmp.ge.f32.partialorder %v260_v11, 0.0  ;;  %v285_v25 = vmul.f32 0.2, %v253_v16  ;;  %v293_v26 = vmul.f32 0.2, %v261_v17 }
  0x22   : > { %612 = vmatprep.subr.mxu0 %v315_v33  ;;  %657 = vmatprep.subr.mxu1 %v315_v33  ;;  %vm269_vm12 = vcmp.ge.f32.partialorder %v253_v16, 0.0  ;;  %vm277_vm13 = vcmp.ge.f32.partialorder %v261_v17, 0.0  ;;  %v300_v27 = vsel %vm268_vm10, %v252_v10, %v284_v21  ;;  %v308_v28 = vsel %vm276_vm11, %v260_v11, %v292_v22 }
  0x23   : > { %613 = vmatpush3.msra.mxu0 %v315_v33  ;;  %673 = vmatpush3.msra.mxu1 %v315_v33  ;;  %v286_v29 = vmul.f32 0.2, %v254_v23  ;;  %v294_v30 = vmul.f32 0.2, %v262_v24  ;;  %v301_v31 = vsel %vm269_vm12, %v253_v16, %v285_v25  ;;  %v309_v32 = vsel %vm277_vm13, %v261_v17, %v293_v26 }
  0x24   : > { %614 = vmatprep.subr.mxu0 %v314_v39  ;;  %658 = vmatprep.subr.mxu1 %v314_v39  ;;  %vm270_vm14 = vcmp.ge.f32.partialorder %v254_v23, 0.0  ;;  %vm278_vm15 = vcmp.ge.f32.partialorder %v262_v24, 0.0  ;;  %vm472_vm0 = vcmask 7168  }
  0x25   : > { %615 = vmatpush3.msra.mxu0 %v314_v39  ;;  %674 = vmatpush3.msra.mxu1 %v314_v39  ;;  %v302_v14 = vsel %vm270_vm14, %v254_v23, %v286_v29  ;;  %v310_v33 = vsel %vm278_vm15, %v262_v24, %v294_v30 }
  0x26   : > { %616 = vmatprep.subr.mxu0 %v313_v46  ;;  %659 = vmatprep.subr.mxu1 %v313_v46 }
  0x27   : > { %617 = vmatpush3.msra.mxu0 %v313_v46  ;;  %675 = vmatpush3.msra.mxu1 %v313_v46 }
  0x28   : > { %618 = vmatprep.subr.mxu0 %v312_v55  ;;  %660 = vmatprep.subr.mxu1 %v312_v55 }
  0x29   : > { %619 = vmatpush3.msra.mxu0 %v312_v55  ;;  %676 = vmatpush3.msra.mxu1 %v312_v55 }
  0x2a   : > { %620 = vmatprep.subr.mxu0 %v311_v62  ;;  %661 = vmatprep.subr.mxu1 %v311_v62 }
  0x2b   : > { %621 = vmatpush3.msra.mxu0 %v311_v62  ;;  %677 = vmatpush3.msra.mxu1 %v311_v62 }
  0x2c   : > { %622 = vmatprep.mubr.f32.mxu0 %v295_v47  ;;  %634 = vmatprep.mubr.f32.mxu1 %v303_v50 }
  0x2d   : > { %623 = vmatmul.mubr.f32.vlgmr.msra.gmra.mxu0 %v296_v59  ;;  %635 = vmatmul.mubr.f32.vlgmr.msra.gmra.mxu1 %v304_v60 }
  0x2e   : > { %625 = vmatprep.mubr.f32.mxu0 %v297_v63  ;;  %637 = vmatprep.mubr.f32.mxu1 %v305_v15 }
  0x31   : > { %626 = vmatmul.mubr.f32.gmra.mxu0 %v298_v18  ;;  %638 = vmatmul.mubr.f32.gmra.mxu1 %v306_v19 }
  0x32   : > { %628 = vmatprep.mubr.f32.mxu0 %v299_v20  ;;  %640 = vmatprep.mubr.f32.mxu1 %v307_v7 }
  0x35   : > { %629 = vmatmul.mubr.f32.gmra.mxu0 %v300_v27  ;;  %641 = vmatmul.mubr.f32.gmra.mxu1 %v308_v28 }
  0x36   : > { %631 = vmatprep.mubr.f32.mxu0 %v301_v31  ;;  %643 = vmatprep.mubr.f32.mxu1 %v309_v32 }
  0x39   : > { %632 = vmatmul.mubr.f32.gmra.mxu0 %v302_v14  ;;  %644 = vmatmul.mubr.f32.gmra.mxu1 %v310_v33 }
  0xed   : > { %v624_v34 = vpop.f32.mrf.mxu0  ;;  %v636_v35 = vpop.f32.mrf.mxu1 }
  0xee   : > { %474 = vst.msk [vmem:[%s858_s11 + $0x8] sm:$0xff] %vm472_vm0, %v624_v34  ;;  %482 = vst.msk [vmem:[%s858_s11 + $0x48] sm:$0xff] %vm472_vm0, %v636_v35 }
  0xef   : > { %v393_v36 = vpop.f32.mrf.mxu0  ;;  %v433_v37 = vpop.f32.mrf.mxu1 }
  0xf0   : > { %473 = vst.msk [vmem:[%s858_s11] sm:$0xff] %vm472_vm0, %v393_v36  ;;  %481 = vst.msk [vmem:[%s858_s11 + $0x40] sm:$0xff] %vm472_vm0, %v433_v37 }
  0xf1   : > { %v627_v38 = vpop.f32.mrf.mxu0  ;;  %v639_v39 = vpop.f32.mrf.mxu1 }
  0xf2   : > { %476 = vst.msk [vmem:[%s858_s11 + $0x18] sm:$0xff] %vm472_vm0, %v627_v38  ;;  %484 = vst.msk [vmem:[%s858_s11 + $0x58] sm:$0xff] %vm472_vm0, %v639_v39 }
  0xf3   : > { %v403_v40 = vpop.f32.mrf.mxu0  ;;  %v443_v41 = vpop.f32.mrf.mxu1 }
  0xf4   : > { %475 = vst.msk [vmem:[%s858_s11 + $0x10] sm:$0xff] %vm472_vm0, %v403_v40  ;;  %483 = vst.msk [vmem:[%s858_s11 + $0x50] sm:$0xff] %vm472_vm0, %v443_v41 }
  0xf5   : > { %v630_v42 = vpop.f32.mrf.mxu0  ;;  %v642_v43 = vpop.f32.mrf.mxu1 }
  0xf6   : > { %478 = vst.msk [vmem:[%s858_s11 + $0x28] sm:$0xff] %vm472_vm0, %v630_v42  ;;  %486 = vst.msk [vmem:[%s858_s11 + $0x68] sm:$0xff] %vm472_vm0, %v642_v43 }
  0xf7   : > { %v413_v44 = vpop.f32.mrf.mxu0  ;;  %v453_v45 = vpop.f32.mrf.mxu1 }
  0xf8   : > { %477 = vst.msk [vmem:[%s858_s11 + $0x20] sm:$0xff] %vm472_vm0, %v413_v44  ;;  %485 = vst.msk [vmem:[%s858_s11 + $0x60] sm:$0xff] %vm472_vm0, %v453_v45 }
  0xf9   : > { %v633_v46 = vpop.f32.mrf.mxu0  ;;  %v645_v47 = vpop.f32.mrf.mxu1 }
  0xfa   : > { %480 = vst.msk [vmem:[%s858_s11 + $0x38] sm:$0xff] %vm472_vm0, %v633_v46  ;;  %488 = vst.msk [vmem:[%s858_s11 + $0x78] sm:$0xff] %vm472_vm0, %v645_v47 }
  0xfb   : > { %v423_v48 = vpop.f32.mrf.mxu0  ;;  %v463_v49 = vpop.f32.mrf.mxu1 }
  0xfc   : > { %479 = vst.msk [vmem:[%s858_s11 + $0x30] sm:$0xff] %vm472_vm0, %v423_v48  ;;  %487 = vst.msk [vmem:[%s858_s11 + $0x70] sm:$0xff] %vm472_vm0, %v463_v49 }
  0xfd PF: > { %s14_s15 = sadd.s32 1, %s692_s15  }
  0xfe   : > { %p11_p4 = scmp.ge.s32.totalorder %s14_s15, 6  }
 0x100   :  { %13 = sbr.rel (!%p11_p4) target bundleno = 1 (0x1), region = 66 }

// kernel: pixel_discriminator_forward.2
= control target key start
LH: loop header
LB: loop body
LE: loop exit
PB: predicated region body
PF: predicated region fallthrough
CT: control target
= control target key end

     0   :  { %s971_s18 = smov 0   ;;  %s1070_s0 = inlined_call_operand.vmem [shape: bf16[512,4], index: 0, kind: input, shape index: {}]   ;;  %s1071_s1 = inlined_call_operand.vmem [shape: bf16[4,64], index: 1, kind: input, shape index: {}]   ;;  %s1072_s2 = inlined_call_operand.vmem [shape: f32[1,64], index: 2, kind: input, shape index: {}]   ;;  %s1073_s3 = inlined_call_operand.vmem [shape: bf16[64,128], index: 3, kind: input, shape index: {}]   ;;  %s1074_s4 = inlined_call_operand.vmem [shape: f32[512,128], index: 4, kind: output, shape index: {0}]   ;;  %s1075_s5 = inlined_call_operand.vmem [shape: f32[4,8,128], index: 5, kind: output, shape index: {1}]  }
   0x1 LB: > { %s977_s19 = sadd.s32 4294967295, %s939_s18   ;;  %p812_p0 = scmp.ge.s32.totalorder %s939_s18, 1  ;;  %s939_s18 = sphi %s971_s18, %s16_s18  }
   0x2   : > { %p191_p1 = scmp.lt.s32.totalorder %s939_s18, 5 }
   0x4   : > { %p192_p2 = pnand %p812_p0, %p191_p1 }
   0x5   : > { %s813_s22 = sshll.u32 (!%p192_p2), %s977_s19, 4  ;;  %p235_p4 = scmp.lt.s32.totalorder (!%p192_p2), %s977_s19, 3 }
   0x6   : > { %195 = sbr.rel (%p192_p2) target bundleno = 469 (0x1d5), region = 36  ;;  %p224_p3 = scmp.lt.s32.totalorder (!%p192_p2), %s813_s22, 63 }
   0xb   : > { %v256_v0 = vld [vmem:[%s1071_s1] sm:$0x3]  ;;  %vm329_vm0 = vcmask 1041408   ;;  %v929_v1 = vld [vmem:[%s1073_s3 + $0x18] sm:$0xff]   ;;  %s1077_s22 = smov (!%p224_p3, %s813_s22), 63  ;;  %vm304_vm1 = vcmask 31744  }
   0xc   : > { %912 = vmatprep.subr.msk.bf16.mxu0 %vm329_vm0, %v256_v0  ;;  %v331_v2 = vsel %vm329_vm0, %v256_v0, 0  ;;  %888 = vmatprep.subr.bf16.mxu1 %v929_v1  ;;  %s814_s25 = sshll.u32 %s1077_s22, 2  ;;  %v930_v11 = vld [vmem:[%s1073_s3 + $0x10] sm:$0xff]   ;;  %v931_v12 = vld [vmem:[%s1073_s3 + $0x8] sm:$0xff]   ;;  %v932_v13 = vld [vmem:[%s1073_s3] sm:$0xff]   ;;  %vm518_vm6 = vcmask 523264  }
   0xd   : > { %871 = vmatpush3.bf16.msra.mxu0 %v331_v2  ;;  %889 = vmatpush3.bf16.msra.mxu1 %v929_v1  ;;  %s227_s28 = scalar_lea.vmem %s1070_s0, %s814_s25  ;;  %v1014_v15 = vld [vmem:[%s1072_s2] ss:$0 sm:$0xff]  ;;  %s816_s12 = sshll.u32 %s1077_s22, 3 }
   0xe   : > { %v921_v3 = vld [vmem:[%s227_s28] sm:$0xff]   ;;  %v922_v4 = vld [vmem:[%s227_s28 + $0x8] sm:$0xff]   ;;  %v923_v5 = vld [vmem:[%s227_s28 + $0x10] sm:$0xff]   ;;  %890 = vmatprep.subr.bf16.mxu1 %v930_v11  ;;  %s1044_s15 = scalar_lea.vmem %s1074_s4, %s816_s12  ;;  %s1079_s19 = smov (!%p235_p4, %s977_s19), 3 }
   0xf   : > { %872 = vmatprep.mubr.msk.bf16.mxu0 %vm304_vm1, %v921_v3  ;;  %v924_v6 = vld [vmem:[%s227_s28 + $0x18] sm:$0xff]   ;;  %v925_v7 = vld [vmem:[%s227_s28 + $0x20] sm:$0xff]   ;;  %v926_v8 = vld [vmem:[%s227_s28 + $0x28] sm:$0xff]   ;;  %s817_s16 = sshll.u32 %s1079_s19, 3 }
  0x10   : > { %873 = vmatmul.mubr.msk.bf16.vlgmr.msra.gmra.mxu0 %vm304_vm1, %v922_v4  ;;  %v927_v9 = vld [vmem:[%s227_s28 + $0x30] sm:$0xff]   ;;  %v928_v10 = vld [vmem:[%s227_s28 + $0x38] sm:$0xff]   ;;  %s238_s21 = scalar_lea.vmem %s1075_s5, %s817_s16 }
  0x11   : > { %876 = vmatprep.mubr.msk.bf16.mxu0 %vm304_vm1, %v923_v5  ;;  %891 = vmatpush3.bf16.msra.mxu1 %v930_v11 }
  0x12   : > { %892 = vmatprep.subr.bf16.mxu1 %v931_v12 }
  0x15   : > { %893 = vmatpush3.bf16.msra.mxu1 %v931_v12 }
  0x16   : > { %894 = vmatprep.subr.bf16.mxu1 %v932_v13 }
  0x18   : > { %877 = vmatmul.mubr.msk.bf16.gmra.mxu0 %vm304_vm1, %v924_v6 }
  0x19   : > { %880 = vmatprep.mubr.msk.bf16.mxu0 %vm304_vm1, %v925_v7  ;;  %895 = vmatpush3.bf16.msra.mxu1 %v932_v13 }
  0x20   : > { %881 = vmatmul.mubr.msk.bf16.gmra.mxu0 %vm304_vm1, %v926_v8 }
  0x21   : > { %884 = vmatprep.mubr.msk.bf16.mxu0 %vm304_vm1, %v927_v9 }
  0x28   : > { %885 = vmatmul.mubr.msk.bf16.gmra.mxu0 %vm304_vm1, %v928_v10 }
  0xd0   : > { %v874_v14 = vpop.f32.mrf.mxu0 }
  0xd1   : > { %v376_v18 = vadd.f32 %v874_v14, %v1014_v15 }
  0xd2   : > { %v367_v16 = vpop.f32.mrf.mxu0 }
  0xd3   : > { %v368_v17 = vadd.f32 %v1014_v15, %v367_v16  ;;  %v448_v25 = vmul.f32 0.2, %v376_v18  ;;  %vm432_vm4 = vcmp.ge.f32.partialorder %v376_v18, 0.0 }
  0xd4   : > { %v875_v19 = vpop.f32.mrf.mxu0 }
  0xd5   : > { %v379_v20 = vadd.f32 %v875_v19, %v1014_v15  ;;  %v446_v22 = vmul.f32 0.2, %v368_v17  ;;  %vm430_vm3 = vcmp.ge.f32.partialorder %v368_v17, 0.0  ;;  %v464_v33 = vsel %vm432_vm4, %v376_v18, %v448_v25 }
  0xd6   : > { %v370_v21 = vpop.f32.mrf.mxu0 }
  0xd7   : > { %vm433_vm2 = vcmp.ge.f32.partialorder %v379_v20, 0.0  ;;  %v449_v23 = vmul.f32 0.2, %v379_v20  ;;  %v371_v24 = vadd.f32 %v1014_v15, %v370_v21  ;;  %v462_v31 = vsel %vm430_vm3, %v368_v17, %v446_v22 }
  0xd8   : > { %v878_v26 = vpop.f32.mrf.mxu0 }
  0xd9   : > { %v447_v27 = vmul.f32 0.2, %v371_v24  ;;  %vm431_vm5 = vcmp.ge.f32.partialorder %v371_v24, 0.0  ;;  %v465_v28 = vsel %vm433_vm2, %v379_v20, %v449_v23  ;;  %v392_v34 = vadd.f32 %v878_v26, %v1014_v15 }
  0xda   : > { %v383_v29 = vpop.f32.mrf.mxu0  ;;  %v479_v37 = vpack.c.bf16 %v465_v28, %v464_v33 }
  0xdb   : > { %v384_v30 = vadd.f32 %v1014_v15, %v383_v29  ;;  %v463_v32 = vsel %vm431_vm5, %v371_v24, %v447_v27  ;;  %v452_v43 = vmul.f32 0.2, %v392_v34  ;;  %vm436_vm9 = vcmp.ge.f32.partialorder %v392_v34, 0.0 }
  0xdc   : > { %v879_v35 = vpop.f32.mrf.mxu0  ;;  %v478_v36 = vpack.c.bf16 %v463_v32, %v462_v31 }
  0xdd   : > { %v395_v38 = vadd.f32 %v879_v35, %v1014_v15  ;;  %v450_v40 = vmul.f32 0.2, %v384_v30  ;;  %vm434_vm8 = vcmp.ge.f32.partialorder %v384_v30, 0.0  ;;  %v468_v51 = vsel %vm436_vm9, %v392_v34, %v452_v43 }
  0xde   : > { %v386_v39 = vpop.f32.mrf.mxu0  ;;  %896 = vmatprep.mubr.msk.bf16.mxu1 %vm518_vm6, %v478_v36 }
  0xdf   : > { %vm437_vm7 = vcmp.ge.f32.partialorder %v395_v38, 0.0  ;;  %v453_v41 = vmul.f32 0.2, %v395_v38  ;;  %v387_v42 = vadd.f32 %v1014_v15, %v386_v39  ;;  %897 = vmatmul.mubr.msk.bf16.vlgmr.msra.gmra.mxu1 %vm518_vm6, %v479_v37  ;;  %v466_v48 = vsel %vm434_vm8, %v384_v30, %v450_v40 }
  0xe0   : > { %v882_v44 = vpop.f32.mrf.mxu0 }
  0xe1   : > { %vm435_vm10 = vcmp.ge.f32.partialorder %v387_v42, 0.0  ;;  %v451_v45 = vmul.f32 0.2, %v387_v42  ;;  %v469_v46 = vsel %vm437_vm7, %v395_v38, %v453_v41  ;;  %v408_v53 = vadd.f32 %v882_v44, %v1014_v15 }
  0xe2   : > { %v399_v47 = vpop.f32.mrf.mxu0  ;;  %v481_v55 = vpack.c.bf16 %v469_v46, %v468_v51 }
  0xe3   : > { %v467_v49 = vsel %vm435_vm10, %v387_v42, %v451_v45  ;;  %v400_v50 = vadd.f32 %v1014_v15, %v399_v47  ;;  %v456_v61 = vmul.f32 0.2, %v408_v53  ;;  %vm440_vm13 = vcmp.ge.f32.partialorder %v408_v53, 0.0 }
  0xe4   : > { %v480_v52 = vpack.c.bf16 %v467_v49, %v466_v48  ;;  %v883_v54 = vpop.f32.mrf.mxu0 }
  0xe5   : > { %v411_v56 = vadd.f32 %v883_v54, %v1014_v15  ;;  %v454_v58 = vmul.f32 0.2, %v400_v50  ;;  %vm438_vm12 = vcmp.ge.f32.partialorder %v400_v50, 0.0  ;;  %v472_v5 = vsel %vm440_vm13, %v408_v53, %v456_v61 }
  0xe6   : > { %v402_v57 = vpop.f32.mrf.mxu0  ;;  %900 = vmatprep.mubr.msk.bf16.mxu1 %vm518_vm6, %v480_v52 }
  0xe7   : > { %vm441_vm11 = vcmp.ge.f32.partialorder %v411_v56, 0.0  ;;  %v457_v59 = vmul.f32 0.2, %v411_v56  ;;  %v403_v60 = vadd.f32 %v1014_v15, %v402_v57  ;;  %901 = vmatmul.mubr.msk.bf16.gmra.mxu1 %vm518_vm6, %v481_v55  ;;  %v470_v2 = vsel %vm438_vm12, %v400_v50, %v454_v58 }
  0xe8   : > { %v886_v62 = vpop.f32.mrf.mxu0 }
  0xe9   : > { %vm439_vm14 = vcmp.ge.f32.partialorder %v403_v60, 0.0  ;;  %v455_v63 = vmul.f32 0.2, %v403_v60  ;;  %v473_v0 = vsel %vm441_vm11, %v411_v56, %v457_v59  ;;  %v424_v7 = vadd.f32 %v886_v62, %v1014_v15 }
  0xea   : > { %v415_v1 = vpop.f32.mrf.mxu0  ;;  %v483_v9 = vpack.c.bf16 %v473_v0, %v472_v5 }
  0xeb   : > { %v471_v3 = vsel %vm439_vm14, %v403_v60, %v455_v63  ;;  %v416_v4 = vadd.f32 %v1014_v15, %v415_v1  ;;  %v460_v16 = vmul.f32 0.2, %v424_v7  ;;  %vm444_vm1 = vcmp.ge.f32.partialorder %v424_v7, 0.0 }
  0xec   : > { %v482_v6 = vpack.c.bf16 %v471_v3, %v470_v2  ;;  %v887_v8 = vpop.f32.mrf.mxu0 }
  0xed   : > { %v427_v10 = vadd.f32 %v887_v8, %v1014_v15  ;;  %v458_v12 = vmul.f32 0.2, %v416_v4  ;;  %vm442_vm0 = vcmp.ge.f32.partialorder %v416_v4, 0.0  ;;  %v476_v21 = vsel %vm444_vm1, %v424_v7, %v460_v16 }
  0xee   : > { %v418_v11 = vpop.f32.mrf.mxu0  ;;  %904 = vmatprep.mubr.msk.bf16.mxu1 %vm518_vm6, %v482_v6 }
  0xef   : > { %vm445_vm15 = vcmp.ge.f32.partialorder %v427_v10, 0.0  ;;  %v461_v13 = vmul.f32 0.2, %v427_v10  ;;  %v419_v14 = vadd.f32 %v1014_v15, %v418_v11  ;;  %905 = vmatmul.mubr.msk.bf16.gmra.mxu1 %vm518_vm6, %v483_v9  ;;  %v474_v19 = vsel %vm442_vm0, %v416_v4, %v458_v12 }
  0xf1   : > { %vm443_vm2 = vcmp.ge.f32.partialorder %v419_v14, 0.0  ;;  %v459_v17 = vmul.f32 0.2, %v419_v14  ;;  %v477_v18 = vsel %vm445_vm15, %v427_v10, %v461_v13 }
  0xf2   : > { %v485_v23 = vpack.c.bf16 %v477_v18, %v476_v21 }
  0xf3   : > { %v475_v20 = vsel %vm443_vm2, %v419_v14, %v459_v17 }
  0xf4   : > { %v484_v22 = vpack.c.bf16 %v475_v20, %v474_v19 }
  0xf6   : > { %908 = vmatprep.mubr.msk.bf16.mxu1 %vm518_vm6, %v484_v22 }
  0xf7   : > { %909 = vmatmul.mubr.msk.bf16.gmra.mxu1 %vm518_vm6, %v485_v23 }
 0x19f   : > { %v898_v15 = vpop.f32.mrf.mxu1 }
 0x1a0   : > { %642 = vst [vmem:[%s1044_s15 + $0x10] sm:$0xff] %v898_v15  ;;  %v679_v31 = vmul.f32 %v898_v15, %v898_v15 }
 0x1a1   : > { %v577_v24 = vpop.f32.mrf.mxu1 }
 0x1a2   : > { %640 = vst [vmem:[%s1044_s15] sm:$0xff] %v577_v24  ;;  %v677_v27 = vmul.f32 %v577_v24, %v577_v24 }
 0x1a3   : > { %v899_v25 = vpop.f32.mrf.mxu1 }
 0x1a4   : > { %643 = vst [vmem:[%s1044_s15 + $0x18] sm:$0xff] %v899_v25  ;;  %v680_v35 = vmul.f32 %v899_v25, %v899_v25 }
 0x1a5   : > { %v580_v26 = vpop.f32.mrf.mxu1 }
 0x1a6   : > { %641 = vst [vmem:[%s1044_s15 + $0x8] sm:$0xff] %v580_v26  ;;  %v656_v28 = vadd.f32 %v580_v26, %v577_v24  ;;  %v678_v29 = vmul.f32 %v580_v26, %v580_v26  ;;  %v714_v24 = vlaneseq }
 0x1a7   : > { %v902_v30 = vpop.f32.mrf.mxu1 }
 0x1a8   : > { %v657_v32 = vadd.f32 %v898_v15, %v656_v28  ;;  %v693_v33 = vadd.f32 %v678_v29, %v677_v27  ;;  %646 = vst [vmem:[%s1044_s15 + $0x30] sm:$0xff] %v902_v30  ;;  %v683_v47 = vmul.f32 %v902_v30, %v902_v30  ;;  %v715_v29 = vshrl.u32 %v714_v24, 7 }
 0x1a9   : > { %v593_v34 = vpop.f32.mrf.mxu1 }
 0x1aa   : > { %v694_v36 = vadd.f32 %v693_v33, %v679_v31  ;;  %644 = vst [vmem:[%s1044_s15 + $0x20] sm:$0xff] %v593_v34  ;;  %v658_v37 = vadd.f32 %v899_v25, %v657_v32  ;;  %v681_v40 = vmul.f32 %v593_v34, %v593_v34  ;;  %vm717_vm3 = vcmp.eq.s32.totalorder %v715_v29, 1 }
 0x1ab   : > { %v903_v38 = vpop.f32.mrf.mxu1  ;;  %vm716_vm4 = vcmp.eq.s32.totalorder %v715_v29, 0 }
 0x1ac   : > { %v659_v39 = vadd.f32 %v658_v37, %v593_v34  ;;  %v695_v41 = vadd.f32 %v694_v36, %v680_v35  ;;  %647 = vst [vmem:[%s1044_s15 + $0x38] sm:$0xff] %v903_v38  ;;  %v684_v51 = vmul.f32 %v903_v38, %v903_v38 }
 0x1ad   : > { %v596_v42 = vpop.f32.mrf.mxu1 }
 0x1ae   : > { %v696_v43 = vadd.f32 %v695_v41, %v681_v40  ;;  %645 = vst [vmem:[%s1044_s15 + $0x28] sm:$0xff] %v596_v42  ;;  %v660_v44 = vadd.f32 %v659_v39, %v596_v42  ;;  %v682_v45 = vmul.f32 %v596_v42, %v596_v42 }
 0x1af   : > { %v906_v46 = vpop.f32.mrf.mxu1 }
 0x1b0   : > { %v661_v48 = vadd.f32 %v902_v30, %v660_v44  ;;  %v697_v49 = vadd.f32 %v696_v43, %v682_v45  ;;  %650 = vst [vmem:[%s1044_s15 + $0x50] sm:$0xff] %v906_v46  ;;  %v687_v63 = vmul.f32 %v906_v46, %v906_v46 }
 0x1b1   : > { %v609_v50 = vpop.f32.mrf.mxu1 }
 0x1b2   : > { %v698_v52 = vadd.f32 %v697_v49, %v683_v47  ;;  %648 = vst [vmem:[%s1044_s15 + $0x40] sm:$0xff] %v609_v50  ;;  %v662_v53 = vadd.f32 %v903_v38, %v661_v48  ;;  %v685_v56 = vmul.f32 %v609_v50, %v609_v50 }
 0x1b3   : > { %v907_v54 = vpop.f32.mrf.mxu1 }
 0x1b4   : > { %v663_v55 = vadd.f32 %v662_v53, %v609_v50  ;;  %v699_v57 = vadd.f32 %v698_v52, %v684_v51  ;;  %651 = vst [vmem:[%s1044_s15 + $0x58] sm:$0xff] %v907_v54  ;;  %v688_v3 = vmul.f32 %v907_v54, %v907_v54 }
 0x1b5   : > { %v612_v58 = vpop.f32.mrf.mxu1 }
 0x1b6   : > { %v700_v59 = vadd.f32 %v699_v57, %v685_v56  ;;  %649 = vst [vmem:[%s1044_s15 + $0x48] sm:$0xff] %v612_v58  ;;  %v664_v60 = vadd.f32 %v663_v55, %v612_v58  ;;  %v686_v61 = vmul.f32 %v612_v58, %v612_v58 }
 0x1b7   : > { %v910_v62 = vpop.f32.mrf.mxu1 }
 0x1b8   : > { %v665_v0 = vadd.f32 %v906_v46, %v664_v60  ;;  %v701_v1 = vadd.f32 %v700_v59, %v686_v61  ;;  %654 = vst [vmem:[%s1044_s15 + $0x70] sm:$0xff] %v910_v62  ;;  %v691_v14 = vmul.f32 %v910_v62, %v910_v62 }
 0x1b9   : > { %v625_v2 = vpop.f32.mrf.mxu1 }
 0x1ba   : > { %v702_v4 = vadd.f32 %v701_v1, %v687_v63  ;;  %652 = vst [vmem:[%s1044_s15 + $0x60] sm:$0xff] %v625_v2  ;;  %v666_v5 = vadd.f32 %v907_v54, %v665_v0  ;;  %v689_v8 = vmul.f32 %v625_v2, %v625_v2 }
 0x1bb   : > { %v911_v6 = vpop.f32.mrf.mxu1 }
 0x1bc   : > { %v667_v7 = vadd.f32 %v666_v5, %v625_v2  ;;  %v703_v9 = vadd.f32 %v702_v4, %v688_v3  ;;  %655 = vst [vmem:[%s1044_s15 + $0x78] sm:$0xff] %v911_v6  ;;  %v692_v18 = vmul.f32 %v911_v6, %v911_v6 }
 0x1bd   : > { %v628_v10 = vpop.f32.mrf.mxu1 }
 0x1be   : > { %v704_v11 = vadd.f32 %v703_v9, %v689_v8  ;;  %653 = vst [vmem:[%s1044_s15 + $0x68] sm:$0xff] %v628_v10  ;;  %v668_v12 = vadd.f32 %v667_v7, %v628_v10  ;;  %v690_v13 = vmul.f32 %v628_v10, %v628_v10 }
 0x1c0   : > { %v669_v16 = vadd.f32 %v910_v62, %v668_v12  ;;  %v705_v17 = vadd.f32 %v704_v11, %v690_v13 }
 0x1c2   : > { %v670_v19 = vadd.f32 %v911_v6, %v669_v16  ;;  %v706_v20 = vadd.f32 %v705_v17, %v691_v14 }
 0x1c4   : > { %v671_v21 = vrot.slane %v670_v19, 4  ;;  %v707_v22 = vadd.f32 %v706_v20, %v692_v18 }
 0x1c6   : > { %v672_v23 = vadd.f32 %v671_v21, %v670_v19  ;;  %v708_v15 = vrot.slane %v707_v22, 4 }
 0x1c8   : > { %v673_v25 = vrot.slane %v672_v23, 2  ;;  %v709_v26 = vadd.f32 %v708_v15, %v707_v22 }
 0x1ca   : > { %v674_v27 = vadd.f32 %v673_v25, %v672_v23  ;;  %v710_v28 = vrot.slane %v709_v26, 2 }
 0x1cc   : > { %v711_v30 = vadd.f32 %v710_v28, %v709_v26  ;;  %v675_v31 = vrot.slane %v674_v27, 1 }
 0x1ce   : > { %v712_v32 = vrot.slane %v711_v30, 1  ;;  %v676_v34 = vadd.f32 %v675_v31, %v674_v27 }
 0x1d0   : > { %v713_v33 = vadd.f32 %v712_v32, %v711_v30 }
 0x1d2   : > { %v718_v35 = vsel %vm717_vm3, %v713_v33, 0.0 }
 0x1d3   : > { %v719_v36 = vsel %vm716_vm4, %v676_v34, %v718_v35 }
 0x1d4   : > { %720 = vst [vmem:[%s238_s21] sm:$0xff] %v719_v36 }
 0x1d5 PF: > { %s16_s18 = sadd.s32 1, %s939_s18  }
 0x1d6   : > { %p13_p5 = scmp.ge.s32.totalorder %s16_s18, 6  }
 0x1d8   :  { %15 = sbr.rel (!%p13_p5) target bundleno = 1 (0x1), region = 78 }

</bundles_post_ra>
